<compile_context>
chip_gen: v7x
topology: tpu7x:2x2x1
jax: 0.10.0
libtpu: 0.0.40
codegen_flags: <defaults>
</compile_context>

<pallas_src>
import functools

import jax
import jax.numpy as jnp
from jax.experimental import pallas as pl
from jax.experimental.pallas import tpu as pltpu

_LANE = 128      # TODO(synk): pad hidden to 256 on v6e/v7x if the kernel ever becomes MXU-bound
_SUBLANE = 8


def _round_up(n, m):
    return ((n + m - 1) // m) * m


def _pad_axis(a, axis, size):
    pad = size - a.shape[axis]
    if pad <= 0:
        return a
    widths = [(0, 0)] * a.ndim
    widths[axis] = (0, pad)
    return jnp.pad(a, widths)


def _vmem_cap_bytes():
    """~75% of this generation's physical VMEM (fallback: assume a 64 MiB part)."""
    try:
        phys = pltpu.get_tpu_info().vmem_capacity_bytes
    except Exception:
        phys = 64 << 20
    return (phys * 3) // 4


def _vmem_limit(need_bytes, cap):
    return int(min(cap, max(32 << 20, int(need_bytes * 1.3) + (2 << 20))))


def _const_spec(shape, single_buffer):
    """BlockSpec for a VMEM-resident operand (constant index_map)."""
    idx = lambda *_: (0,) * len(shape)
    if single_buffer:
        # The block never changes -> one buffer is enough (saves VMEM on v7x).
        return pl.BlockSpec(shape, idx, pipeline_mode=pl.Buffered(1))
    return pl.BlockSpec(shape, idx)


def _choose_batch_tile(b_rows, block_b):
    """b_rows is the batch rounded up to a multiple of 8 (sublane)."""
    if b_rows <= block_b:
        # Small batch: one or two tiles. Two tiles let the "parallel" batch
        # axis shard across both v7x TensorCores.
        if b_rows >= 16 and b_rows % 16 == 0:
            return b_rows // 2
        return b_rows
    # Large batch: prefer the largest tile <= block_b that divides b_rows so
    # no batch padding / output slicing (extra HBM passes) is needed.
    for tb in range(block_b, 63, -8):
        if b_rows % tb == 0:
            return tb
    return block_b


def _pick_d_tile(d_total, block_d):
    """Largest multiple of 128 dividing d_total (itself a multiple of 128), <= block_d."""
    best = _LANE
    t = _LANE
    limit = min(d_total, max(block_d, _LANE))
    while t <= limit:
        if d_total % t == 0:
            best = t
        t += _LANE
    return best


def _sigmoid(y):
    # sigmoid(y) == 0.5 * tanh(0.5 * y) + 0.5 : one EUP op instead of exp + reciprocal.
    return 0.5 * jnp.tanh(0.5 * y) + 0.5


# ----------------------------------------------------------------------------
# Kernels
# ----------------------------------------------------------------------------
def _fused_kernel(x_ref, w1_ref, b1_ref, w23_ref, b23_ref, w4_ref, b4_ref, o_ref):
    """One (TB, D) batch tile through the whole encoder+decoder MLP."""
    cdt = w1_ref.dtype
    x = x_ref[...].astype(cdt)                     # in-kernel cast, hidden under DMA
    h1 = jnp.dot(x, w1_ref[...], preferred_element_type=jnp.float32) + b1_ref[...]
    h1 = jnp.maximum(h1, 0.0).astype(cdt)          # ReLU
    h2 = jnp.dot(h1, w23_ref[...], preferred_element_type=jnp.float32) + b23_ref[...]
    h2 = jnp.maximum(h2, 0.0).astype(cdt)          # ReLU (middle Linears folded into W23)
    y = jnp.dot(h2, w4_ref[...], preferred_element_type=jnp.float32) + b4_ref[...]
    o_ref[...] = _sigmoid(y).astype(o_ref.dtype)


def _encoder_kernel(x_ref, w1_ref, b1_ref, w23_ref, b23_ref, h2_ref, acc_ref):
    """Large-D path: K-reduction over D.  h2 = ReLU(ReLU(x@w1 + b1) @ W23 + b23)."""
    k = pl.program_id(1)

    @pl.when(k == 0)
    def _():
        acc_ref[...] = jnp.zeros_like(acc_ref)

    cdt = w1_ref.dtype
    acc_ref[...] += jnp.dot(x_ref[...].astype(cdt), w1_ref[...],
                            preferred_element_type=jnp.float32)

    @pl.when(k == pl.num_programs(1) - 1)
    def _():
        h1 = jnp.maximum(acc_ref[...] + b1_ref[...], 0.0).astype(cdt)
        h2 = jnp.dot(h1, w23_ref[...], preferred_element_type=jnp.float32) + b23_ref[...]
        h2_ref[...] = jnp.maximum(h2, 0.0).astype(h2_ref.dtype)


def _decoder_kernel(h2_ref, w4_ref, b4_ref, o_ref):
    """Large-D path: N-tile over D.  out[:, j] = sigmoid(h2 @ w4[:, j] + b4[j])."""
    cdt = w4_ref.dtype
    y = jnp.dot(h2_ref[...].astype(cdt), w4_ref[...],
                preferred_element_type=jnp.float32) + b4_ref[...]
    o_ref[...] = _sigmoid(y).astype(o_ref.dtype)


# ----------------------------------------------------------------------------
# Wrapper
# ----------------------------------------------------------------------------
@functools.partial(
    jax.jit,
    static_argnames=("n_channels", "im_size", "block_b", "block_d",
                     "compute_dtype", "out_dtype", "d_split"))
def autoencoder_forward(x, params, *, n_channels, im_size,
                        block_b=512, block_d=2048,
                        compute_dtype=jnp.float32, out_dtype=jnp.float32,
                        d_split=None):
    """x: (B, C, H, W).  Returns (B, C, H, W) in `out_dtype`.

    compute_dtype=bf16 streams weights / runs the MXU natively in bf16
    (recommended for throughput, especially on v5e); out_dtype=bf16 halves the
    output HBM write when the consumer tolerates it.  d_split=True forces the
    large-D two-kernel path (auto-enabled when the fused kernel would not fit
    the generation's VMEM budget).
    """
    B = x.shape[0]
    assert B >= 1
    assert block_b % _SUBLANE == 0 and block_b >= _SUBLANE
    D = n_channels * im_size * im_size

    w1, b1, w2, b2, w3, b3, w4, b4 = params
    hidden_dim = w1.shape[1]
    Hp = _round_up(hidden_dim, _LANE)

    cdt = jnp.dtype(compute_dtype)
    odt = jnp.dtype(out_dtype)

    # ---- Weight prep (small, once per call): fold the two middle Linears
    # (no nonlinearity between them), zero-pad hidden to a lane multiple, cast
    # matmul operands to the compute dtype.  Zero padding is exact: padded
    # activation columns are ReLU(0)=0 and padded weight rows only multiply them.
    w23 = jnp.dot(w2, w3)                                        # (H, H)
    b23 = jnp.dot(b2, w3) + b3                                   # (1, H)
    w1p = _pad_axis(w1, 1, Hp).astype(cdt)                       # (D, Hp)
    w23p = _pad_axis(_pad_axis(w23, 0, Hp), 1, Hp).astype(cdt)   # (Hp, Hp)
    w4p = _pad_axis(w4, 0, Hp).astype(cdt)                       # (Hp, D)
    b1p = _pad_axis(b1, 1, Hp).astype(jnp.float32)               # (1, Hp)
    b23p = _pad_axis(b23, 1, Hp).astype(jnp.float32)             # (1, Hp)
    b4p = b4.astype(jnp.float32)                                 # (1, D)

    # ---- Batch tiling: pad only to the 8-row sublane, keep >=2 grid steps
    # when possible (v7x megacore), and skip pad/slice if B already divides.
    x_flat = x.reshape(B, D)              # torch.nn.Flatten order; stays f32 here
    b_rows = _round_up(B, _SUBLANE)
    TB = _choose_batch_tile(b_rows, block_b)
    B_pad = _round_up(b_rows, TB)
    if B_pad != B:
        x_flat = jnp.pad(x_flat, ((0, B_pad - B), (0, 0)))

    cap = _vmem_cap_bytes()
    w_bytes = (D * Hp + Hp * Hp + Hp * D) * cdt.itemsize
    single_w = w_bytes > (8 << 20)       # single-buffer resident weights once they matter
    wbuf = 1 if single_w else 2

    fused_need = (wbuf * (w_bytes + 8 * (2 * Hp + D) * 4)                 # weights + biases
                  + 2 * TB * D * (4 + odt.itemsize)                       # x / out tiles (2-buf)
                  + 4 * TB * (2 * Hp + D) + TB * D * cdt.itemsize)        # in-kernel temporaries
    if d_split is None:
        use_split = int(fused_need * 1.3) + (2 << 20) > cap
    else:
        use_split = bool(d_split)

    if not use_split:
        # -------- Fully fused path: one HBM pass over x and out per call. ----
        grid = (B_pad // TB,)
        out_flat = pl.pallas_call(
            _fused_kernel,
            out_shape=jax.ShapeDtypeStruct((B_pad, D), odt),
            grid=grid,
            in_specs=[
                pl.BlockSpec((TB, D), lambda i: (i, 0)),      # x tile (pipelined, f32)
                _const_spec((D, Hp), single_w),               # w1      (VMEM resident)
                _const_spec((1, Hp), False),                  # b1
                _const_spec((Hp, Hp), single_w),              # w2 @ w3 (folded)
                _const_spec((1, Hp), False),                  # b2 @ w3 + b3
                _const_spec((Hp, D), single_w),               # w4
                _const_spec((1, D), False),                   # b4
            ],
            out_specs=pl.BlockSpec((TB, D), lambda i: (i, 0)),
            compiler_params=pltpu.CompilerParams(
                dimension_semantics=("parallel",),
                vmem_limit_bytes=_vmem_limit(fused_need, cap)),
        )(x_flat, w1p, b1p, w23p, b23p, w4p, b4p)
        D_out = D
    else:
        # -------- Large-D path: K-reduction encoder + N-tiled decoder. -------
        D_pad = _round_up(D, _LANE)
        TD = _pick_d_tile(D_pad, block_d)
        if D_pad != D:
            x_flat = _pad_axis(x_flat, 1, D_pad)
            w1p = _pad_axis(w1p, 0, D_pad)
            w4p = _pad_axis(w4p, 1, D_pad)
            b4p = _pad_axis(b4p, 1, D_pad)
        nk = D_pad // TD
        nb = B_pad // TB

        enc_need = (2 * TD * Hp * cdt.itemsize + wbuf * Hp * Hp * cdt.itemsize
                    + 2 * 8 * 2 * Hp * 4 + 2 * TB * TD * 4
                    + 2 * TB * Hp * cdt.itemsize + TB * Hp * 4
                    + 4 * TB * Hp + TB * TD * cdt.itemsize)
        h2 = pl.pallas_call(
            _encoder_kernel,
            out_shape=jax.ShapeDtypeStruct((B_pad, Hp), cdt),
            grid=(nb, nk),
            in_specs=[
                pl.BlockSpec((TB, TD), lambda i, k: (i, k)),   # x tile
                pl.BlockSpec((TD, Hp), lambda i, k: (k, 0)),   # w1 K-slab
                _const_spec((1, Hp), False),                   # b1
                _const_spec((Hp, Hp), single_w),               # w2 @ w3
                _const_spec((1, Hp), False),                   # b2 @ w3 + b3
            ],
            out_specs=pl.BlockSpec((TB, Hp), lambda i, k: (i, 0)),
            scratch_shapes=[pltpu.VMEM((TB, Hp), jnp.float32)],
            compiler_params=pltpu.CompilerParams(
                dimension_semantics=("parallel", "arbitrary"),
                vmem_limit_bytes=_vmem_limit(enc_need, cap)),
        )(x_flat, w1p, b1p, w23p, b23p)

        dec_need = (2 * Hp * TD * cdt.itemsize + 2 * 8 * TD * 4
                    + 2 * TB * Hp * cdt.itemsize + 2 * TB * TD * odt.itemsize
                    + 4 * TB * TD + TB * Hp * cdt.itemsize)
        out_flat = pl.pallas_call(
            _decoder_kernel,
            out_shape=jax.ShapeDtypeStruct((B_pad, D_pad), odt),
            grid=(nb, nk),
            in_specs=[
                pl.BlockSpec((TB, Hp), lambda i, j: (i, 0)),   # h2
                pl.BlockSpec((Hp, TD), lambda i, j: (0, j)),   # w4 N-slab
                pl.BlockSpec((1, TD), lambda i, j: (0, j)),    # b4 N-slab
            ],
            out_specs=pl.BlockSpec((TB, TD), lambda i, j: (i, j)),
            compiler_params=pltpu.CompilerParams(
                dimension_semantics=("parallel", "parallel"),
                vmem_limit_bytes=_vmem_limit(dec_need, cap)),
        )(h2, w4p, b4p)
        D_out = D_pad

    # Padded batch rows contain sigmoid(bias) != 0 -> must be sliced off.
    if B_pad != B:
        out_flat = out_flat[:B]
    if D_out != D:
        out_flat = out_flat[:, :D]
    return out_flat.reshape(B, n_channels, im_size, im_size)


# ----------------------------------------------------------------------------
# Params / reference
# ----------------------------------------------------------------------------
def init_params(key, n_channels, im_size, z_dim, hidden_dim):
    """Matches torch.nn.Linear's U(-1/sqrt(fan_in), +1/sqrt(fan_in)) init."""
    D = n_channels * im_size * im_size

    def linear(key, fan_in, fan_out):
        kw, kb = jax.random.split(key)
        bound = 1.0 / jnp.sqrt(jnp.float32(fan_in))
        w = jax.random.uniform(kw, (fan_in, fan_out), jnp.float32, -bound, bound)
        b = jax.random.uniform(kb, (1, fan_out), jnp.float32, -bound, bound)
        return w, b

    k1, k2, k3, k4 = jax.random.split(key, 4)
    w1, b1 = linear(k1, D, hidden_dim)        # encoder Linear(D, hidden)
    w2, b2 = linear(k2, hidden_dim, z_dim)    # encoder Linear(hidden, z)
    w3, b3 = linear(k3, z_dim, hidden_dim)    # decoder Linear(z, hidden)
    w4, b4 = linear(k4, hidden_dim, D)        # decoder Linear(hidden, D)
    return (w1, b1, w2, b2, w3, b3, w4, b4)


def reference_forward(x, params, n_channels, im_size):
    """Pure-JAX reference (unfused, matches the PyTorch module)."""
    w1, b1, w2, b2, w3, b3, w4, b4 = params
    B = x.shape[0]
    xf = x.reshape(B, -1)
    h1 = jnp.maximum(xf @ w1 + b1, 0.0)
    z = h1 @ w2 + b2
    h2 = jnp.maximum(z @ w3 + b3, 0.0)
    y = jax.nn.sigmoid(h2 @ w4 + b4)
    return y.reshape(B, n_channels, im_size, im_size)


if __name__ == "__main__":
    batch, n_channels, im_size, z_dim, hidden_dim = 2, 4, 16, 100, 32

    key = jax.random.PRNGKey(0)
    kx, kp = jax.random.split(key)
    x = jax.random.normal(kx, (batch, n_channels, im_size, im_size), jnp.float32)
    params = init_params(kp, n_channels, im_size, z_dim, hidden_dim)
    ref = reference_forward(x, params, n_channels, im_size)

    # 1) f32 fused path (default).
    out = autoencoder_forward(x, params, n_channels=n_channels, im_size=im_size)
    out = jax.block_until_ready(out)
    assert out.shape == (batch, n_channels, im_size, im_size)
    assert out.dtype == jnp.float32
    assert jnp.allclose(out, ref, atol=1e-4, rtol=1e-4)

    # 2) bf16 streaming path (MXU-native; halves weight / activation traffic).
    out_bf16 = autoencoder_forward(x, params, n_channels=n_channels, im_size=im_size,
                                   compute_dtype=jnp.bfloat16)
    out_bf16 = jax.block_until_ready(out_bf16)
    assert jnp.allclose(out_bf16, ref, atol=5e-2, rtol=5e-2)

    # 3) Larger batch: multi-tile grid with no batch padding / output slice.
    xb = jax.random.normal(kx, (256, n_channels, im_size, im_size), jnp.float32)
    refb = reference_forward(xb, params, n_channels, im_size)
    outb = autoencoder_forward(xb, params, n_channels=n_channels, im_size=im_size)
    outb = jax.block_until_ready(outb)
    assert jnp.allclose(outb, refb, atol=1e-4, rtol=1e-4)

    # 4) Forced large-D path (K-reduction encoder + N-tiled decoder).
    outs = autoencoder_forward(x, params, n_channels=n_channels, im_size=im_size,
                               d_split=True, block_d=256)
    outs = jax.block_until_ready(outs)
    assert jnp.allclose(outs, ref, atol=1e-4, rtol=1e-4)

    print("KERNEL_OK")
</pallas_src>

<mosaic_0001>
module attributes {stable_mosaic.version = 11 : i64} {
  func.func @_fused_kernel(%arg0: i32, %arg1: memref<8x1024xf32, #tpu.memory_space<vmem>>, %arg2: memref<1024x128xf32, #tpu.memory_space<vmem>>, %arg3: memref<1x128xf32, #tpu.memory_space<vmem>>, %arg4: memref<128x128xf32, #tpu.memory_space<vmem>>, %arg5: memref<1x128xf32, #tpu.memory_space<vmem>>, %arg6: memref<128x1024xf32, #tpu.memory_space<vmem>>, %arg7: memref<1x1024xf32, #tpu.memory_space<vmem>>, %arg8: memref<8x1024xf32, #tpu.memory_space<vmem>>) attributes {dimension_semantics = [#tpu.dimension_semantics<parallel>], iteration_bounds = array<i64: 1>, scalar_prefetch = 0 : i64, scratch_operands = 0 : i64, tpu.core_type = #tpu.core_type<tc>, window_params = [{transform_indices = @transform_0, window_bounds = array<i64: 8, 1024>}, {pipeline_mode = #tpu.pipeline_mode<synchronous>, transform_indices = @transform_1, window_bounds = array<i64: 1024, 128>}, {pipeline_mode = #tpu.pipeline_mode<synchronous>, transform_indices = @transform_2, window_bounds = array<i64: 1, 128>}, {pipeline_mode = #tpu.pipeline_mode<synchronous>, transform_indices = @transform_3, window_bounds = array<i64: 128, 128>}, {pipeline_mode = #tpu.pipeline_mode<synchronous>, transform_indices = @transform_4, window_bounds = array<i64: 1, 128>}, {pipeline_mode = #tpu.pipeline_mode<synchronous>, transform_indices = @transform_5, window_bounds = array<i64: 128, 1024>}, {pipeline_mode = #tpu.pipeline_mode<synchronous>, transform_indices = @transform_6, window_bounds = array<i64: 1, 1024>}, {transform_indices = @transform_7, window_bounds = array<i64: 8, 1024>}]} {
    %c0 = arith.constant 0 : index
    %c0_0 = arith.constant 0 : index
    %0 = vector.load %arg1[%c0, %c0_0] : memref<8x1024xf32, #tpu.memory_space<vmem>>, vector<8x1024xf32>
    %c0_1 = arith.constant 0 : index
    %c0_2 = arith.constant 0 : index
    %1 = vector.load %arg2[%c0_1, %c0_2] : memref<1024x128xf32, #tpu.memory_space<vmem>>, vector<1024x128xf32>
    %cst = arith.constant dense<0.000000e+00> : vector<8x128xf32>
    %2 = tpu.matmul %0, %1, %cst {dimension_numbers = #tpu.dot_dimension_numbers<[1], [0], [0], [1], [0, 0, 1, 1], [], []>} : vector<8x1024xf32>, vector<1024x128xf32>, vector<8x128xf32> -> vector<8x128xf32>
    %c0_3 = arith.constant 0 : index
    %c0_4 = arith.constant 0 : index
    %3 = vector.load %arg3[%c0_3, %c0_4] : memref<1x128xf32, #tpu.memory_space<vmem>>, vector<1x128xf32>
    %4 = vector.broadcast %3 : vector<1x128xf32> to vector<8x128xf32>
    %5 = arith.addf %2, %4 : vector<8x128xf32>
    %cst_5 = arith.constant 0.000000e+00 : f32
    %6 = vector.broadcast %cst_5 : f32 to vector<8x128xf32>
    %7 = arith.maximumf %5, %6 : vector<8x128xf32>
    %c0_6 = arith.constant 0 : index
    %c0_7 = arith.constant 0 : index
    %8 = vector.load %arg4[%c0_6, %c0_7] : memref<128x128xf32, #tpu.memory_space<vmem>>, vector<128x128xf32>
    %cst_8 = arith.constant dense<0.000000e+00> : vector<8x128xf32>
    %9 = tpu.matmul %7, %8, %cst_8 {dimension_numbers = #tpu.dot_dimension_numbers<[1], [0], [0], [1], [0, 0, 1, 1], [], []>} : vector<8x128xf32>, vector<128x128xf32>, vector<8x128xf32> -> vector<8x128xf32>
    %c0_9 = arith.constant 0 : index
    %c0_10 = arith.constant 0 : index
    %10 = vector.load %arg5[%c0_9, %c0_10] : memref<1x128xf32, #tpu.memory_space<vmem>>, vector<1x128xf32>
    %11 = vector.broadcast %10 : vector<1x128xf32> to vector<8x128xf32>
    %12 = arith.addf %9, %11 : vector<8x128xf32>
    %cst_11 = arith.constant 0.000000e+00 : f32
    %13 = vector.broadcast %cst_11 : f32 to vector<8x128xf32>
    %14 = arith.maximumf %12, %13 : vector<8x128xf32>
    %c0_12 = arith.constant 0 : index
    %c0_13 = arith.constant 0 : index
    %15 = vector.load %arg6[%c0_12, %c0_13] : memref<128x1024xf32, #tpu.memory_space<vmem>>, vector<128x1024xf32>
    %cst_14 = arith.constant dense<0.000000e+00> : vector<8x1024xf32>
    %16 = tpu.matmul %14, %15, %cst_14 {dimension_numbers = #tpu.dot_dimension_numbers<[1], [0], [0], [1], [0, 0, 1, 1], [], []>} : vector<8x128xf32>, vector<128x1024xf32>, vector<8x1024xf32> -> vector<8x1024xf32>
    %c0_15 = arith.constant 0 : index
    %c0_16 = arith.constant 0 : index
    %17 = vector.load %arg7[%c0_15, %c0_16] : memref<1x1024xf32, #tpu.memory_space<vmem>>, vector<1x1024xf32>
    %18 = vector.broadcast %17 : vector<1x1024xf32> to vector<8x1024xf32>
    %19 = arith.addf %16, %18 : vector<8x1024xf32>
    %cst_17 = arith.constant 5.000000e-01 : f32
    %20 = vector.broadcast %cst_17 : f32 to vector<8x1024xf32>
    %21 = arith.mulf %20, %19 : vector<8x1024xf32>
    %22 = math.tanh %21 : vector<8x1024xf32>
    %cst_18 = arith.constant 5.000000e-01 : f32
    %23 = vector.broadcast %cst_18 : f32 to vector<8x1024xf32>
    %24 = arith.mulf %23, %22 : vector<8x1024xf32>
    %cst_19 = arith.constant 5.000000e-01 : f32
    %25 = vector.broadcast %cst_19 : f32 to vector<8x1024xf32>
    %26 = arith.addf %24, %25 : vector<8x1024xf32>
    %c0_20 = arith.constant 0 : index
    %c0_21 = arith.constant 0 : index
    %27 = vector.load %arg8[%c0_20, %c0_21] : memref<8x1024xf32, #tpu.memory_space<vmem>>, vector<8x1024xf32>
    tpu.vector_store %arg8[%c0_20, %c0_21], %26 {strides = array<i32>} : memref<8x1024xf32, #tpu.memory_space<vmem>>, vector<8x1024xf32>,
    return
  }
  func.func @transform_0(%arg0: i32) -> (i32, i32) {
    %c0_i32 = arith.constant 0 : i32
    %c0_i32_0 = arith.constant 0 : i32
    return %arg0, %c0_i32 : i32, i32
  }
  func.func @transform_1(%arg0: i32) -> (i32, i32) {
    %c0_i32 = arith.constant 0 : i32
    %c0_i32_0 = arith.constant 0 : i32
    %c0_i32_1 = arith.constant 0 : i32
    return %c0_i32, %c0_i32_0 : i32, i32
  }
  func.func @transform_2(%arg0: i32) -> (i32, i32) {
    %c0_i32 = arith.constant 0 : i32
    %c0_i32_0 = arith.constant 0 : i32
    %c0_i32_1 = arith.constant 0 : i32
    return %c0_i32, %c0_i32_0 : i32, i32
  }
  func.func @transform_3(%arg0: i32) -> (i32, i32) {
    %c0_i32 = arith.constant 0 : i32
    %c0_i32_0 = arith.constant 0 : i32
    %c0_i32_1 = arith.constant 0 : i32
    return %c0_i32, %c0_i32_0 : i32, i32
  }
  func.func @transform_4(%arg0: i32) -> (i32, i32) {
    %c0_i32 = arith.constant 0 : i32
    %c0_i32_0 = arith.constant 0 : i32
    %c0_i32_1 = arith.constant 0 : i32
    return %c0_i32, %c0_i32_0 : i32, i32
  }
  func.func @transform_5(%arg0: i32) -> (i32, i32) {
    %c0_i32 = arith.constant 0 : i32
    %c0_i32_0 = arith.constant 0 : i32
    %c0_i32_1 = arith.constant 0 : i32
    return %c0_i32, %c0_i32_0 : i32, i32
  }
  func.func @transform_6(%arg0: i32) -> (i32, i32) {
    %c0_i32 = arith.constant 0 : i32
    %c0_i32_0 = arith.constant 0 : i32
    %c0_i32_1 = arith.constant 0 : i32
    return %c0_i32, %c0_i32_0 : i32, i32
  }
  func.func @transform_7(%arg0: i32) -> (i32, i32) {
    %c0_i32 = arith.constant 0 : i32
    %c0_i32_0 = arith.constant 0 : i32
    return %arg0, %c0_i32 : i32, i32
  }
}

</mosaic_0001>

<bundles_post_ra>
// kernel: autoencoder_forward.1
= control target key start
LH: loop header
LB: loop body
LE: loop exit
PB: predicated region body
PF: predicated region fallthrough
CT: control target
= control target key end

     0   :  { %vm1536_vm0 = vmmov 0   ;;  %s2462_s1 = inlined_call_operand.vmem [shape: f32[1024,128], index: 1, kind: input, shape index: {}]   ;;  %s2463_s0 = inlined_call_operand.vmem [shape: f32[8,1024], index: 0, kind: input, shape index: {}]   ;;  %s2464_s3 = inlined_call_operand.vmem [shape: f32[128,128], index: 3, kind: input, shape index: {}]   ;;  %s2465_s5 = inlined_call_operand.vmem [shape: f32[128,1024], index: 5, kind: input, shape index: {}]   ;;  %s2466_s2 = inlined_call_operand.vmem [shape: f32[1,128], index: 2, kind: input, shape index: {}]   ;;  %s2467_s4 = inlined_call_operand.vmem [shape: f32[1,128], index: 4, kind: input, shape index: {}]   ;;  %s2468_s6 = inlined_call_operand.vmem [shape: f32[1,1024], index: 6, kind: input, shape index: {}]   ;;  %s2469_s7 = inlined_call_operand.vmem [shape: f32[8,1024], index: 7, kind: output, shape index: {}]  }
   0x1   :  { %v50_v0 = vld [vmem:[%s2462_s1 + $0x80] sm:$0xff]  ;;  %v51_v1 = vld [vmem:[%s2462_s1 + $0x88] sm:$0xff]  ;;  %v52_v11 = vld [vmem:[%s2462_s1 + $0x90] sm:$0xff] }
   0x2   :  { %v34_v2 = vld [vmem:[%s2462_s1] sm:$0xff]  ;;  %v1236_v3 = vpack.c.bf16 %v51_v1, %v50_v0  ;;  %v35_v4 = vld [vmem:[%s2462_s1 + $0x8] sm:$0xff]  ;;  %v53_v13 = vld [vmem:[%s2462_s1 + $0x98] sm:$0xff] }
   0x3   :  { %v82_v5 = vld [vmem:[%s2462_s1 + $0x180] sm:$0xff]  ;;  %v83_v6 = vld [vmem:[%s2462_s1 + $0x188] sm:$0xff]  ;;  %v1238_v7 = vpack.c.bf16 %v35_v4, %v34_v2  ;;  %v36_v14 = vld [vmem:[%s2462_s1 + $0x10] sm:$0xff]  ;;  %v1240_v16 = vpack.c.bf16 %v53_v13, %v52_v11 }
   0x4   :  { %v1268_v8 = vpack.c.bf16 %v83_v6, %v82_v5  ;;  %v66_v9 = vld [vmem:[%s2462_s1 + $0x100] sm:$0xff]  ;;  %v67_v10 = vld [vmem:[%s2462_s1 + $0x108] sm:$0xff]  ;;  %1237 = vmatprep.subr.bf16.mxu0 %v1236_v3  ;;  %v37_v15 = vld [vmem:[%s2462_s1 + $0x18] sm:$0xff] }
   0x5   :  { %v1270_v12 = vpack.c.bf16 %v67_v10, %v66_v9  ;;  %1239 = vmatpush3.bf16.msra.mxu0 %v1238_v7  ;;  %v1242_v17 = vpack.c.bf16 %v37_v15, %v36_v14  ;;  %v84_v18 = vld [vmem:[%s2462_s1 + $0x190] sm:$0xff]  ;;  %v85_v19 = vld [vmem:[%s2462_s1 + $0x198] sm:$0xff]  ;;  %v54_v23 = vld [vmem:[%s2462_s1 + $0xa0] sm:$0xff] }
   0x6   :  { %1269 = vmatprep.subr.bf16.mxu1 %v1268_v8  ;;  %v68_v20 = vld [vmem:[%s2462_s1 + $0x110] sm:$0xff]  ;;  %v1272_v21 = vpack.c.bf16 %v85_v19, %v84_v18  ;;  %v69_v22 = vld [vmem:[%s2462_s1 + $0x118] sm:$0xff]  ;;  %v55_v24 = vld [vmem:[%s2462_s1 + $0xa8] sm:$0xff]  ;;  %1241 = vmatprep.subr.bf16.mxu0 %v1240_v16 }
   0x7   :  { %1271 = vmatpush3.bf16.msra.mxu1 %v1270_v12  ;;  %v1274_v25 = vpack.c.bf16 %v69_v22, %v68_v20  ;;  %v1244_v26 = vpack.c.bf16 %v55_v24, %v54_v23  ;;  %v38_v27 = vld [vmem:[%s2462_s1 + $0x20] sm:$0xff]  ;;  %v39_v28 = vld [vmem:[%s2462_s1 + $0x28] sm:$0xff]  ;;  %v56_v35 = vld [vmem:[%s2462_s1 + $0xb0] sm:$0xff] }
   0x8   :  { %v86_v29 = vld [vmem:[%s2462_s1 + $0x1a0] sm:$0xff]  ;;  %1273 = vmatprep.subr.bf16.mxu1 %v1272_v21  ;;  %v87_v30 = vld [vmem:[%s2462_s1 + $0x1a8] sm:$0xff]  ;;  %v1246_v33 = vpack.c.bf16 %v39_v28, %v38_v27  ;;  %v57_v36 = vld [vmem:[%s2462_s1 + $0xb8] sm:$0xff] }
   0x9   :  { %v70_v31 = vld [vmem:[%s2462_s1 + $0x120] sm:$0xff]  ;;  %v71_v32 = vld [vmem:[%s2462_s1 + $0x128] sm:$0xff]  ;;  %1243 = vmatpush3.bf16.msra.mxu0 %v1242_v17  ;;  %v1276_v34 = vpack.c.bf16 %v87_v30, %v86_v29  ;;  %v40_v37 = vld [vmem:[%s2462_s1 + $0x30] sm:$0xff]  ;;  %v1248_v39 = vpack.c.bf16 %v57_v36, %v56_v35 }
   0xa   :  { %1245 = vmatprep.subr.bf16.mxu0 %v1244_v26  ;;  %v1278_v38 = vpack.c.bf16 %v71_v32, %v70_v31  ;;  %v41_v40 = vld [vmem:[%s2462_s1 + $0x38] sm:$0xff]  ;;  %v88_v41 = vld [vmem:[%s2462_s1 + $0x1b0] sm:$0xff]  ;;  %v58_v46 = vld [vmem:[%s2462_s1 + $0xc0] sm:$0xff] }
   0xb   :  { %1275 = vmatpush3.bf16.msra.mxu1 %v1274_v25  ;;  %v89_v42 = vld [vmem:[%s2462_s1 + $0x1b8] sm:$0xff]  ;;  %v72_v44 = vld [vmem:[%s2462_s1 + $0x130] sm:$0xff]  ;;  %v59_v47 = vld [vmem:[%s2462_s1 + $0xc8] sm:$0xff]  ;;  %v1250_v48 = vpack.c.bf16 %v41_v40, %v40_v37 }
   0xc   :  { %1277 = vmatprep.subr.bf16.mxu1 %v1276_v34  ;;  %v1280_v43 = vpack.c.bf16 %v89_v42, %v88_v41  ;;  %v73_v45 = vld [vmem:[%s2462_s1 + $0x138] sm:$0xff]  ;;  %v90_v49 = vld [vmem:[%s2462_s1 + $0x1c0] sm:$0xff]  ;;  %v91_v50 = vld [vmem:[%s2462_s1 + $0x1c8] sm:$0xff]  ;;  %v1252_v52 = vpack.c.bf16 %v59_v47, %v58_v46 }
   0xd   :  { %1247 = vmatpush3.bf16.msra.mxu0 %v1246_v33  ;;  %v1282_v51 = vpack.c.bf16 %v73_v45, %v72_v44  ;;  %v42_v53 = vld [vmem:[%s2462_s1 + $0x40] sm:$0xff]  ;;  %v43_v54 = vld [vmem:[%s2462_s1 + $0x48] sm:$0xff]  ;;  %v1284_v56 = vpack.c.bf16 %v91_v50, %v90_v49  ;;  %v60_v58 = vld [vmem:[%s2462_s1 + $0xd0] sm:$0xff] }
   0xe   :  { %1249 = vmatprep.subr.bf16.mxu0 %v1248_v39  ;;  %v74_v55 = vld [vmem:[%s2462_s1 + $0x140] sm:$0xff]  ;;  %v75_v57 = vld [vmem:[%s2462_s1 + $0x148] sm:$0xff]  ;;  %v61_v59 = vld [vmem:[%s2462_s1 + $0xd8] sm:$0xff]  ;;  %v1254_v62 = vpack.c.bf16 %v43_v54, %v42_v53 }
   0xf   :  { %1279 = vmatpush3.bf16.msra.mxu1 %v1278_v38  ;;  %v92_v60 = vld [vmem:[%s2462_s1 + $0x1d0] sm:$0xff]  ;;  %v93_v61 = vld [vmem:[%s2462_s1 + $0x1d8] sm:$0xff]  ;;  %v1286_v63 = vpack.c.bf16 %v75_v57, %v74_v55  ;;  %v1256_v0 = vpack.c.bf16 %v61_v59, %v60_v58  ;;  %v62_v6 = vld [vmem:[%s2462_s1 + $0xe0] sm:$0xff] }
  0x10   :  { %1281 = vmatprep.subr.bf16.mxu1 %v1280_v43  ;;  %v44_v1 = vld [vmem:[%s2462_s1 + $0x50] sm:$0xff]  ;;  %v45_v2 = vld [vmem:[%s2462_s1 + $0x58] sm:$0xff]  ;;  %v1288_v4 = vpack.c.bf16 %v93_v61, %v92_v60  ;;  %v63_v7 = vld [vmem:[%s2462_s1 + $0xe8] sm:$0xff] }
  0x11   :  { %1251 = vmatpush3.bf16.msra.mxu0 %v1250_v48  ;;  %v76_v3 = vld [vmem:[%s2462_s1 + $0x150] sm:$0xff]  ;;  %v77_v5 = vld [vmem:[%s2462_s1 + $0x158] sm:$0xff]  ;;  %v94_v8 = vld [vmem:[%s2462_s1 + $0x1e0] sm:$0xff]  ;;  %v1258_v10 = vpack.c.bf16 %v45_v2, %v44_v1  ;;  %v1260_v14 = vpack.c.bf16 %v63_v7, %v62_v6 }
  0x12   :  { %1253 = vmatprep.subr.bf16.mxu0 %v1252_v52  ;;  %v95_v9 = vld [vmem:[%s2462_s1 + $0x1e8] sm:$0xff]  ;;  %v46_v11 = vld [vmem:[%s2462_s1 + $0x60] sm:$0xff]  ;;  %v1290_v13 = vpack.c.bf16 %v77_v5, %v76_v3  ;;  %v64_v19 = vld [vmem:[%s2462_s1 + $0xf0] sm:$0xff] }
  0x13   :  { %1283 = vmatpush3.bf16.msra.mxu1 %v1282_v51  ;;  %v47_v12 = vld [vmem:[%s2462_s1 + $0x68] sm:$0xff]  ;;  %v78_v15 = vld [vmem:[%s2462_s1 + $0x160] sm:$0xff]  ;;  %v1292_v18 = vpack.c.bf16 %v95_v9, %v94_v8  ;;  %v65_v20 = vld [vmem:[%s2462_s1 + $0xf8] sm:$0xff] }
  0x14   :  { %1285 = vmatprep.subr.bf16.mxu1 %v1284_v56  ;;  %v79_v16 = vld [vmem:[%s2462_s1 + $0x168] sm:$0xff]  ;;  %v29_v21 = vld [vmem:[%s2463_s0 + $0x18] sm:$0xff]  ;;  %v96_v22 = vld [vmem:[%s2462_s1 + $0x1f0] sm:$0xff]  ;;  %v1262_v24 = vpack.c.bf16 %v47_v12, %v46_v11  ;;  %v1264_v26 = vpack.c.bf16 %v65_v20, %v64_v19 }
  0x15   :  { %1255 = vmatpush3.bf16.msra.mxu0 %v1254_v62  ;;  %v27_v17 = vld [vmem:[%s2463_s0 + $0x8] sm:$0xff]  ;;  %v97_v23 = vld [vmem:[%s2462_s1 + $0x1f8] sm:$0xff]  ;;  %303 = vmatprep.mubr.f32.mxu1 %v29_v21  ;;  %v1294_v25 = vpack.c.bf16 %v79_v16, %v78_v15  ;;  %v48_v27 = vld [vmem:[%s2462_s1 + $0x70] sm:$0xff] }
  0x16   :  { %1257 = vmatprep.subr.bf16.mxu0 %v1256_v0  ;;  %233 = vmatprep.mubr.f32.mxu0 %v27_v17  ;;  %v49_v28 = vld [vmem:[%s2462_s1 + $0x78] sm:$0xff]  ;;  %v80_v29 = vld [vmem:[%s2462_s1 + $0x170] sm:$0xff]  ;;  %v1296_v30 = vpack.c.bf16 %v97_v23, %v96_v22  ;;  %v114_v32 = vld [vmem:[%s2462_s1 + $0x280] sm:$0xff] }
  0x17   :  { %1287 = vmatpush3.bf16.msra.mxu1 %v1286_v63  ;;  %v81_v31 = vld [vmem:[%s2462_s1 + $0x178] sm:$0xff]  ;;  %v115_v33 = vld [vmem:[%s2462_s1 + $0x288] sm:$0xff]  ;;  %v146_v34 = vld [vmem:[%s2462_s1 + $0x380] sm:$0xff]  ;;  %v1266_v36 = vpack.c.bf16 %v49_v28, %v48_v27 }
  0x18   :  { %1289 = vmatprep.subr.bf16.mxu1 %v1288_v4  ;;  %v147_v35 = vld [vmem:[%s2462_s1 + $0x388] sm:$0xff]  ;;  %v1298_v37 = vpack.c.bf16 %v81_v31, %v80_v29  ;;  %v1300_v38 = vpack.c.bf16 %v115_v33, %v114_v32  ;;  %v98_v39 = vld [vmem:[%s2462_s1 + $0x200] sm:$0xff]  ;;  %v116_v44 = vld [vmem:[%s2462_s1 + $0x290] sm:$0xff] }
  0x19   :  { %1259 = vmatpush3.bf16.msra.mxu0 %v1258_v10  ;;  %v99_v40 = vld [vmem:[%s2462_s1 + $0x208] sm:$0xff]  ;;  %v130_v41 = vld [vmem:[%s2462_s1 + $0x300] sm:$0xff]  ;;  %v1332_v42 = vpack.c.bf16 %v147_v35, %v146_v34  ;;  %v117_v45 = vld [vmem:[%s2462_s1 + $0x298] sm:$0xff] }
  0x1a   :  { %1261 = vmatprep.subr.bf16.mxu0 %v1260_v14  ;;  %v131_v43 = vld [vmem:[%s2462_s1 + $0x308] sm:$0xff]  ;;  %v148_v46 = vld [vmem:[%s2462_s1 + $0x390] sm:$0xff]  ;;  %v149_v47 = vld [vmem:[%s2462_s1 + $0x398] sm:$0xff]  ;;  %v1302_v49 = vpack.c.bf16 %v99_v40, %v98_v39  ;;  %v1304_v52 = vpack.c.bf16 %v117_v45, %v116_v44 }
  0x1b   :  { %1291 = vmatpush3.bf16.msra.mxu1 %v1290_v13  ;;  %v26_v48 = vld [vmem:[%s2463_s0] sm:$0xff]  ;;  %v28_v50 = vld [vmem:[%s2463_s0 + $0x10] sm:$0xff]  ;;  %v1334_v51 = vpack.c.bf16 %v131_v43, %v130_v41  ;;  %v101_v54 = vld [vmem:[%s2462_s1 + $0x218] sm:$0xff]  ;;  %v1336_v56 = vpack.c.bf16 %v149_v47, %v148_v46 }
  0x1c   :  { %1293 = vmatprep.subr.bf16.mxu1 %v1292_v18  ;;  %v100_v53 = vld [vmem:[%s2462_s1 + $0x210] sm:$0xff]  ;;  %v133_v57 = vld [vmem:[%s2462_s1 + $0x318] sm:$0xff]  ;;  %v118_v58 = vld [vmem:[%s2462_s1 + $0x2a0] sm:$0xff] }
  0x1d   :  { %1263 = vmatpush3.bf16.msra.mxu0 %v1262_v24  ;;  %v132_v55 = vld [vmem:[%s2462_s1 + $0x310] sm:$0xff]  ;;  %v119_v59 = vld [vmem:[%s2462_s1 + $0x2a8] sm:$0xff]  ;;  %v150_v60 = vld [vmem:[%s2462_s1 + $0x3a0] sm:$0xff]  ;;  %v1306_v62 = vpack.c.bf16 %v101_v54, %v100_v53 }
  0x1e   :  { %1265 = vmatprep.subr.bf16.mxu0 %v1264_v26  ;;  %v151_v61 = vld [vmem:[%s2462_s1 + $0x3a8] sm:$0xff]  ;;  %v1338_v63 = vpack.c.bf16 %v133_v57, %v132_v55  ;;  %v1308_v0 = vpack.c.bf16 %v119_v59, %v118_v58  ;;  %v102_v1 = vld [vmem:[%s2462_s1 + $0x220] sm:$0xff]  ;;  %v120_v6 = vld [vmem:[%s2462_s1 + $0x2b0] sm:$0xff] }
  0x1f   :  { %1295 = vmatpush3.bf16.msra.mxu1 %v1294_v25  ;;  %v103_v2 = vld [vmem:[%s2462_s1 + $0x228] sm:$0xff]  ;;  %v134_v3 = vld [vmem:[%s2462_s1 + $0x320] sm:$0xff]  ;;  %v1340_v4 = vpack.c.bf16 %v151_v61, %v150_v60  ;;  %v121_v7 = vld [vmem:[%s2462_s1 + $0x2b8] sm:$0xff] }
  0x20   :  { %1297 = vmatprep.subr.bf16.mxu1 %v1296_v30  ;;  %v135_v5 = vld [vmem:[%s2462_s1 + $0x328] sm:$0xff]  ;;  %v152_v8 = vld [vmem:[%s2462_s1 + $0x3b0] sm:$0xff]  ;;  %v153_v9 = vld [vmem:[%s2462_s1 + $0x3b8] sm:$0xff]  ;;  %v1310_v10 = vpack.c.bf16 %v103_v2, %v102_v1  ;;  %v1312_v12 = vpack.c.bf16 %v121_v7, %v120_v6 }
  0x21   :  { %1267 = vmatpush3.bf16.msra.mxu0 %v1266_v36  ;;  %v1342_v11 = vpack.c.bf16 %v135_v5, %v134_v3  ;;  %v104_v13 = vld [vmem:[%s2462_s1 + $0x230] sm:$0xff]  ;;  %v105_v14 = vld [vmem:[%s2462_s1 + $0x238] sm:$0xff]  ;;  %v1344_v16 = vpack.c.bf16 %v153_v9, %v152_v8  ;;  %v122_v18 = vld [vmem:[%s2462_s1 + $0x2c0] sm:$0xff]  ;;  %v1535_v8 = vmov 0.0|0.0  }
  0x22   :  { %1301 = vmatprep.subr.bf16.mxu0 %v1300_v38  ;;  %v136_v15 = vld [vmem:[%s2462_s1 + $0x330] sm:$0xff]  ;;  %v137_v17 = vld [vmem:[%s2462_s1 + $0x338] sm:$0xff]  ;;  %v123_v19 = vld [vmem:[%s2462_s1 + $0x2c8] sm:$0xff]  ;;  %v1314_v22 = vpack.c.bf16 %v105_v14, %v104_v13 }
  0x23   :  { %1299 = vmatpush3.bf16.msra.mxu1 %v1298_v37  ;;  %v154_v20 = vld [vmem:[%s2462_s1 + $0x3c0] sm:$0xff]  ;;  %v155_v21 = vld [vmem:[%s2462_s1 + $0x3c8] sm:$0xff]  ;;  %v33_v24 = vld [vmem:[%s2463_s0 + $0x38] sm:$0xff]  ;;  %v1346_v25 = vpack.c.bf16 %v137_v17, %v136_v15  ;;  %v1316_v26 = vpack.c.bf16 %v123_v19, %v122_v18 }
  0x24   :  { %1333 = vmatprep.subr.bf16.mxu1 %v1332_v42  ;;  %234 = vmatmul.mubr.f32.vlgmr.msra.gmra.mrb[0].mxu0 %v26_v48  ;;  %v31_v23 = vld [vmem:[%s2463_s0 + $0x28] sm:$0xff]  ;;  %v106_v27 = vld [vmem:[%s2462_s1 + $0x240] sm:$0xff]  ;;  %v1348_v30 = vpack.c.bf16 %v155_v21, %v154_v20  ;;  %v124_v32 = vld [vmem:[%s2462_s1 + $0x2d0] sm:$0xff] }
  0x25   :  { %1303 = vmatpush3.bf16.msra.mxu0 %v1302_v49  ;;  %v107_v28 = vld [vmem:[%s2462_s1 + $0x248] sm:$0xff]  ;;  %v138_v29 = vld [vmem:[%s2462_s1 + $0x340] sm:$0xff]  ;;  %v125_v33 = vld [vmem:[%s2462_s1 + $0x2d8] sm:$0xff]  ;;  %373 = vmatprep.mubr.f32.mxu0 %v31_v23 }
  0x26   :  { %304 = vmatmul.mubr.f32.vlgmr.msra.gmra.mrb[0].mxu1 %v28_v50  ;;  %1305 = vmatprep.subr.bf16.mxu0 %v1304_v52  ;;  %v139_v31 = vld [vmem:[%s2462_s1 + $0x348] sm:$0xff]  ;;  %v156_v34 = vld [vmem:[%s2462_s1 + $0x3d0] sm:$0xff]  ;;  %v157_v35 = vld [vmem:[%s2462_s1 + $0x3d8] sm:$0xff]  ;;  %v1318_v36 = vpack.c.bf16 %v107_v28, %v106_v27  ;;  %v1320_v38 = vpack.c.bf16 %v125_v33, %v124_v32  ;;  %v1537_v33 = vmov 0.0  }
  0x27   :  { %1335 = vmatpush3.bf16.msra.mxu1 %v1334_v51  ;;  %443 = vmatprep.mubr.f32.mxu1 %v33_v24  ;;  %v1350_v37 = vpack.c.bf16 %v139_v31, %v138_v29  ;;  %v108_v39 = vld [vmem:[%s2462_s1 + $0x250] sm:$0xff]  ;;  %v109_v40 = vld [vmem:[%s2462_s1 + $0x258] sm:$0xff]  ;;  %v1352_v42 = vpack.c.bf16 %v157_v35, %v156_v34  ;;  %v126_v44 = vld [vmem:[%s2462_s1 + $0x2e0] sm:$0xff] }
  0x28   :  { %1337 = vmatprep.subr.bf16.mxu1 %v1336_v56  ;;  %v140_v41 = vld [vmem:[%s2462_s1 + $0x350] sm:$0xff]  ;;  %v141_v43 = vld [vmem:[%s2462_s1 + $0x358] sm:$0xff]  ;;  %v127_v45 = vld [vmem:[%s2462_s1 + $0x2e8] sm:$0xff]  ;;  %v1322_v48 = vpack.c.bf16 %v109_v40, %v108_v39 }
  0x29   :  { %1307 = vmatpush3.bf16.msra.mxu0 %v1306_v62  ;;  %v158_v46 = vld [vmem:[%s2462_s1 + $0x3e0] sm:$0xff]  ;;  %v159_v47 = vld [vmem:[%s2462_s1 + $0x3e8] sm:$0xff]  ;;  %v1354_v49 = vpack.c.bf16 %v141_v43, %v140_v41  ;;  %v1324_v50 = vpack.c.bf16 %v127_v45, %v126_v44  ;;  %v128_v56 = vld [vmem:[%s2462_s1 + $0x2f0] sm:$0xff] }
  0x2a   :  { %1309 = vmatprep.subr.bf16.mxu0 %v1308_v0  ;;  %v110_v51 = vld [vmem:[%s2462_s1 + $0x260] sm:$0xff]  ;;  %v111_v52 = vld [vmem:[%s2462_s1 + $0x268] sm:$0xff]  ;;  %v1356_v54 = vpack.c.bf16 %v159_v47, %v158_v46  ;;  %v129_v57 = vld [vmem:[%s2462_s1 + $0x2f8] sm:$0xff] }
  0x2b   :  { %1339 = vmatpush3.bf16.msra.mxu1 %v1338_v63  ;;  %v142_v53 = vld [vmem:[%s2462_s1 + $0x360] sm:$0xff]  ;;  %v143_v55 = vld [vmem:[%s2462_s1 + $0x368] sm:$0xff]  ;;  %v160_v58 = vld [vmem:[%s2462_s1 + $0x3f0] sm:$0xff]  ;;  %v1326_v60 = vpack.c.bf16 %v111_v52, %v110_v51  ;;  %v1328_v62 = vpack.c.bf16 %v129_v57, %v128_v56 }
  0x2c   :  { %1341 = vmatprep.subr.bf16.mxu1 %v1340_v4  ;;  %v161_v59 = vld [vmem:[%s2462_s1 + $0x3f8] sm:$0xff]  ;;  %v1358_v61 = vpack.c.bf16 %v143_v55, %v142_v53  ;;  %v112_v63 = vld [vmem:[%s2462_s1 + $0x270] sm:$0xff]  ;;  %v30_v6 = vld [vmem:[%s2463_s0 + $0x20] sm:$0xff] }
  0x2d   :  { %1311 = vmatpush3.bf16.msra.mxu0 %v1310_v10  ;;  %v113_v0 = vld [vmem:[%s2462_s1 + $0x278] sm:$0xff]  ;;  %v1360_v1 = vpack.c.bf16 %v161_v59, %v160_v58  ;;  %v144_v2 = vld [vmem:[%s2462_s1 + $0x370] sm:$0xff]  ;;  %v450_v9 = vld [vmem:[%s2464_s3] sm:$0xff] }
  0x2e   :  { %1313 = vmatprep.subr.bf16.mxu0 %v1312_v12  ;;  %v145_v3 = vld [vmem:[%s2462_s1 + $0x378] sm:$0xff]  ;;  %v1330_v4 = vpack.c.bf16 %v113_v0, %v112_v63  ;;  %v32_v7 = vld [vmem:[%s2463_s0 + $0x30] sm:$0xff]  ;;  %v451_v10 = vld [vmem:[%s2464_s3 + $0x8] sm:$0xff] }
  0x2f   :  { %1343 = vmatpush3.bf16.msra.mxu1 %v1342_v11  ;;  %v1362_v5 = vpack.c.bf16 %v145_v3, %v144_v2  ;;  %v452_v11 = vld [vmem:[%s2464_s3 + $0x10] sm:$0xff]  ;;  %v1365_v12 = vpack.c.bf16 %v451_v10, %v450_v9  ;;  %v453_v13 = vld [vmem:[%s2464_s3 + $0x18] sm:$0xff]  ;;  %v454_v15 = vld [vmem:[%s2464_s3 + $0x20] sm:$0xff] }
  0x30   :  { %1345 = vmatprep.subr.bf16.mxu1 %v1344_v16  ;;  %v1368_v14 = vpack.c.bf16 %v453_v13, %v452_v11  ;;  %v455_v16 = vld [vmem:[%s2464_s3 + $0x28] sm:$0xff]  ;;  %v456_v18 = vld [vmem:[%s2464_s3 + $0x30] sm:$0xff]  ;;  %v457_v19 = vld [vmem:[%s2464_s3 + $0x38] sm:$0xff] }
  0x31   :  { %1315 = vmatpush3.bf16.msra.mxu0 %v1314_v22  ;;  %v1371_v17 = vpack.c.bf16 %v455_v16, %v454_v15  ;;  %v1374_v20 = vpack.c.bf16 %v457_v19, %v456_v18  ;;  %v458_v21 = vld [vmem:[%s2464_s3 + $0x40] sm:$0xff]  ;;  %v459_v22 = vld [vmem:[%s2464_s3 + $0x48] sm:$0xff]  ;;  %v460_v24 = vld [vmem:[%s2464_s3 + $0x50] sm:$0xff] }
  0x32   :  { %1317 = vmatprep.subr.bf16.mxu0 %v1316_v26  ;;  %v1377_v23 = vpack.c.bf16 %v459_v22, %v458_v21  ;;  %v462_v27 = vld [vmem:[%s2464_s3 + $0x60] sm:$0xff]  ;;  %v463_v28 = vld [vmem:[%s2464_s3 + $0x68] sm:$0xff]  ;;  %v465_v31 = vld [vmem:[%s2464_s3 + $0x78] sm:$0xff] }
  0x33   :  { %1347 = vmatpush3.bf16.msra.mxu1 %v1346_v25  ;;  %v461_v25 = vld [vmem:[%s2464_s3 + $0x58] sm:$0xff]  ;;  %v1383_v29 = vpack.c.bf16 %v463_v28, %v462_v27  ;;  %v545_v34 = vld [vmem:[%s2465_s5 + $0x8] sm:$0xff]  ;;  %v544_v39 = vld [vmem:[%s2465_s5] sm:$0xff] }
  0x34   :  { %1349 = vmatprep.subr.bf16.mxu1 %v1348_v30  ;;  %v1380_v26 = vpack.c.bf16 %v461_v25, %v460_v24  ;;  %v464_v30 = vld [vmem:[%s2464_s3 + $0x70] sm:$0xff]  ;;  %v553_v35 = vld [vmem:[%s2465_s5 + $0x48] sm:$0xff]  ;;  %v552_v40 = vld [vmem:[%s2465_s5 + $0x40] sm:$0xff] }
  0x35   :  { %1319 = vmatpush3.bf16.msra.mxu0 %v1318_v36  ;;  %v1386_v32 = vpack.c.bf16 %v465_v31, %v464_v30  ;;  %v547_v36 = vld [vmem:[%s2465_s5 + $0x18] sm:$0xff]  ;;  %v561_v43 = vld [vmem:[%s2465_s5 + $0x88] sm:$0xff]  ;;  %v560_v46 = vld [vmem:[%s2465_s5 + $0x80] sm:$0xff] }
  0x36   :  { %1321 = vmatprep.subr.bf16.mxu0 %v1320_v38  ;;  %v555_v38 = vld [vmem:[%s2465_s5 + $0x58] sm:$0xff]  ;;  %v569_v44 = vld [vmem:[%s2465_s5 + $0xc8] sm:$0xff]  ;;  %v568_v47 = vld [vmem:[%s2465_s5 + $0xc0] sm:$0xff] }
  0x37   :  { %1351 = vmatpush3.bf16.msra.mxu1 %v1350_v37  ;;  %v1388_v37 = vpack.c.bf16 %v553_v35, %v545_v34  ;;  %v1420_v41 = vpack.c.bf16 %v555_v38, %v547_v36  ;;  %v1392_v45 = vpack.c.bf16 %v569_v44, %v561_v43  ;;  %v576_v52 = vld [vmem:[%s2465_s5 + $0x100] sm:$0xff]  ;;  %v593_v55 = vld [vmem:[%s2465_s5 + $0x188] sm:$0xff]  ;;  %v546_v31 = vld [vmem:[%s2465_s5 + $0x10] sm:$0xff] }
  0x38   :  { %1353 = vmatprep.subr.bf16.mxu1 %v1352_v42  ;;  %v1390_v42 = vpack.c.bf16 %v552_v40, %v544_v39  ;;  %v584_v53 = vld [vmem:[%s2465_s5 + $0x140] sm:$0xff]  ;;  %v601_v56 = vld [vmem:[%s2465_s5 + $0x1c8] sm:$0xff]  ;;  %v563_v34 = vld [vmem:[%s2465_s5 + $0x98] sm:$0xff] }
  0x39   :  { %1323 = vmatpush3.bf16.msra.mxu0 %v1322_v48  ;;  %v1394_v48 = vpack.c.bf16 %v568_v47, %v560_v46  ;;  %v1400_v57 = vpack.c.bf16 %v601_v56, %v593_v55  ;;  %v592_v58 = vld [vmem:[%s2465_s5 + $0x180] sm:$0xff]  ;;  %v625_v3 = vld [vmem:[%s2465_s5 + $0x288] sm:$0xff]  ;;  %v571_v35 = vld [vmem:[%s2465_s5 + $0xd8] sm:$0xff] }
  0x3a   :  { %1325 = vmatprep.subr.bf16.mxu0 %v1324_v50  ;;  %v585_v50 = vld [vmem:[%s2465_s5 + $0x148] sm:$0xff]  ;;  %v600_v59 = vld [vmem:[%s2465_s5 + $0x1c0] sm:$0xff]  ;;  %v1424_v39 = vpack.c.bf16 %v571_v35, %v563_v34  ;;  %v562_v40 = vld [vmem:[%s2465_s5 + $0x90] sm:$0xff] }
  0x3b   :  { %1355 = vmatpush3.bf16.msra.mxu1 %v1354_v49  ;;  %v577_v49 = vld [vmem:[%s2465_s5 + $0x108] sm:$0xff]  ;;  %v608_v0 = vld [vmem:[%s2465_s5 + $0x200] sm:$0xff]  ;;  %v587_v43 = vld [vmem:[%s2465_s5 + $0x158] sm:$0xff] }
  0x3c   :  { %1357 = vmatprep.subr.bf16.mxu1 %v1356_v54  ;;  %v1396_v51 = vpack.c.bf16 %v585_v50, %v577_v49  ;;  %v1398_v54 = vpack.c.bf16 %v584_v53, %v576_v52  ;;  %v641_v9 = vld [vmem:[%s2465_s5 + $0x308] sm:$0xff]  ;;  %v648_v13 = vld [vmem:[%s2465_s5 + $0x340] sm:$0xff]  ;;  %v578_v46 = vld [vmem:[%s2465_s5 + $0x110] sm:$0xff] }
  0x3d   :  { %1327 = vmatpush3.bf16.msra.mxu0 %v1326_v60  ;;  %v1402_v60 = vpack.c.bf16 %v600_v59, %v592_v58  ;;  %v649_v10 = vld [vmem:[%s2465_s5 + $0x348] sm:$0xff]  ;;  %v1042_v16 = vld [vmem:[%s2466_s2] ss:$0 sm:$0xff]  ;;  %v586_v47 = vld [vmem:[%s2465_s5 + $0x150] sm:$0xff] }
  0x3e   :  { %1329 = vmatprep.subr.bf16.mxu0 %v1328_v62  ;;  %v617_v62 = vld [vmem:[%s2465_s5 + $0x248] sm:$0xff]  ;;  %v1412_v11 = vpack.c.bf16 %v649_v10, %v641_v9  ;;  %v603_v49 = vld [vmem:[%s2465_s5 + $0x1d8] sm:$0xff]  ;;  %v1430_v50 = vpack.c.bf16 %v586_v47, %v578_v46  ;;  %v594_v52 = vld [vmem:[%s2465_s5 + $0x190] sm:$0xff] }
  0x3f   :  { %1359 = vmatpush3.bf16.msra.mxu1 %v1358_v61  ;;  %v609_v61 = vld [vmem:[%s2465_s5 + $0x208] sm:$0xff]  ;;  %v602_v53 = vld [vmem:[%s2465_s5 + $0x1d0] sm:$0xff]  ;;  %v619_v55 = vld [vmem:[%s2465_s5 + $0x258] sm:$0xff] }
  0x40   :  { %1361 = vmatprep.subr.bf16.mxu1 %v1360_v1  ;;  %v1404_v63 = vpack.c.bf16 %v617_v62, %v609_v61  ;;  %v616_v1 = vld [vmem:[%s2465_s5 + $0x240] sm:$0xff]  ;;  %v1434_v56 = vpack.c.bf16 %v602_v53, %v594_v52  ;;  %v610_v58 = vld [vmem:[%s2465_s5 + $0x210] sm:$0xff]  ;;  %v635_v61 = vld [vmem:[%s2465_s5 + $0x2d8] sm:$0xff] }
  0x41   :  { %1331 = vmatpush3.bf16.msra.mxu0 %v1330_v4  ;;  %v1406_v2 = vpack.c.bf16 %v616_v1, %v608_v0  ;;  %v633_v4 = vld [vmem:[%s2465_s5 + $0x2c8] sm:$0xff]  ;;  %v618_v59 = vld [vmem:[%s2465_s5 + $0x250] sm:$0xff]  ;;  %v591_v52 = vld [vmem:[%s2465_s5 + $0x178] sm:$0xff] }
  0x42   :  { %1364 = vmatprep.subr.bf16.mxu0 %v1535_v8  ;;  %v1438_v62 = vpack.c.bf16 %v618_v59, %v610_v58  ;;  %v626_v0 = vld [vmem:[%s2465_s5 + $0x290] sm:$0xff]  ;;  %v657_v9 = vld [vmem:[%s2465_s5 + $0x388] sm:$0xff] }
  0x43   :  { %1363 = vmatpush3.bf16.msra.mxu1 %v1362_v5  ;;  %v1408_v5 = vpack.c.bf16 %v633_v4, %v625_v3  ;;  %v634_v1 = vld [vmem:[%s2465_s5 + $0x2d0] sm:$0xff]  ;;  %v651_v3 = vld [vmem:[%s2465_s5 + $0x358] sm:$0xff]  ;;  %v665_v10 = vld [vmem:[%s2465_s5 + $0x3c8] sm:$0xff] }
  0x44   :  { %374 = vmatmul.mubr.f32.vlgmr.msra.gmra.mrb[2].mxu0 %v30_v6  ;;  %1389 = vmatprep.subr.bf16.mxu1 %v1388_v37  ;;  %v624_v6 = vld [vmem:[%s2465_s5 + $0x280] sm:$0xff]  ;;  %v1442_v4 = vpack.c.bf16 %v634_v1, %v626_v0  ;;  %v573_v35 = vld [vmem:[%s2465_s5 + $0xe8] sm:$0xff]  ;;  %v566_v47 = vld [vmem:[%s2465_s5 + $0xb0] sm:$0xff] }
  0x45   :  { %1366 = vmatpush3.bf16.msra.mxu0 %v1365_v12  ;;  %1233 = vmatprep.mubr.msk.f32.mxu0 %vm1536_vm0, %v1537_v33  ;;  %v640_v12 = vld [vmem:[%s2465_s5 + $0x300] sm:$0xff]  ;;  %v582_v59 = vld [vmem:[%s2465_s5 + $0x130] sm:$0xff]  ;;  %v607_v0 = vld [vmem:[%s2465_s5 + $0x1f8] sm:$0xff] }
  0x46   :  { %444 = vmatmul.mubr.f32.vlgmr.msra.gmra.mrb[2].mxu1 %v32_v7  ;;  %1367 = vmatprep.subr.bf16.mxu0 %v1535_v8  ;;  %v632_v7 = vld [vmem:[%s2465_s5 + $0x2c0] sm:$0xff] }
  0x47   :  { %778 = vmatprep.mubr.f32.mxu1 %v1537_v33  ;;  %1391 = vmatpush1.bf16.msra.mxu1 %v1390_v42  ;;  %v579_v42 = vld [vmem:[%s2465_s5 + $0x118] sm:$0xff] }
  0x48   :  { %1393 = vmatprep.subr.bf16.mxu1 %v1392_v45  ;;  %v1428_v45 = vpack.c.bf16 %v587_v43, %v579_v42  ;;  %v564_v42 = vld [vmem:[%s2465_s5 + $0xa0] sm:$0xff] }
  0x49   :  { %1369 = vmatpush3.bf16.msra.mxu0 %v1368_v14  ;;  %v1414_v14 = vpack.c.bf16 %v648_v13, %v640_v12  ;;  %v1416_v12 = vpack.c.bf16 %v665_v10, %v657_v9  ;;  %v667_v13 = vld [vmem:[%s2465_s5 + $0x3d8] sm:$0xff]  ;;  %v572_v43 = vld [vmem:[%s2465_s5 + $0xe0] sm:$0xff]  ;;  %v621_v9 = vld [vmem:[%s2465_s5 + $0x268] sm:$0xff] }
  0x4a   :  { %1370 = vmatprep.subr.bf16.mxu0 %v1535_v8  ;;  %v1458_v53 = vpack.c.bf16 %v572_v43, %v564_v42  ;;  %v615_v10 = vld [vmem:[%s2465_s5 + $0x238] sm:$0xff]  ;;  %v646_v43 = vld [vmem:[%s2465_s5 + $0x330] sm:$0xff] }
  0x4b   :  { %1395 = vmatpush1.bf16.msra.mxu1 %v1394_v48  ;;  %v595_v48 = vld [vmem:[%s2465_s5 + $0x198] sm:$0xff] }
  0x4c   :  { %1397 = vmatprep.subr.bf16.mxu1 %v1396_v51  ;;  %v1432_v51 = vpack.c.bf16 %v603_v49, %v595_v48  ;;  %v574_v48 = vld [vmem:[%s2465_s5 + $0xf0] sm:$0xff]  ;;  %v581_v49 = vld [vmem:[%s2465_s5 + $0x128] sm:$0xff] }
  0x4d   :  { %1372 = vmatpush3.bf16.msra.mxu0 %v1371_v17 }
  0x4e   :  { %1373 = vmatprep.subr.bf16.mxu0 %v1535_v8 }
  0x4f   :  { %1399 = vmatpush1.bf16.msra.mxu1 %v1398_v54  ;;  %v611_v54 = vld [vmem:[%s2465_s5 + $0x218] sm:$0xff] }
  0x50   :  { %1401 = vmatprep.subr.bf16.mxu1 %v1400_v57  ;;  %v1436_v57 = vpack.c.bf16 %v619_v55, %v611_v54  ;;  %v1490_v54 = vpack.c.bf16 %v574_v48, %v566_v47  ;;  %v580_v55 = vld [vmem:[%s2465_s5 + $0x120] sm:$0xff]  ;;  %v669_v47 = vld [vmem:[%s2465_s5 + $0x3e8] sm:$0xff]  ;;  %v663_v48 = vld [vmem:[%s2465_s5 + $0x3b8] sm:$0xff] }
  0x51   :  { %1375 = vmatpush3.bf16.msra.mxu0 %v1374_v20 }
  0x52   :  { %1376 = vmatprep.subr.bf16.mxu0 %v1535_v8 }
  0x53   :  { %1403 = vmatpush1.bf16.msra.mxu1 %v1402_v60  ;;  %v627_v60 = vld [vmem:[%s2465_s5 + $0x298] sm:$0xff] }
  0x54   :  { %1405 = vmatprep.subr.bf16.mxu1 %v1404_v63  ;;  %v1440_v63 = vpack.c.bf16 %v635_v61, %v627_v60  ;;  %v590_v60 = vld [vmem:[%s2465_s5 + $0x170] sm:$0xff]  ;;  %v597_v61 = vld [vmem:[%s2465_s5 + $0x1a8] sm:$0xff] }
  0x55   :  { %1378 = vmatpush3.bf16.msra.mxu0 %v1377_v23 }
  0x56   :  { %1379 = vmatprep.subr.bf16.mxu0 %v1535_v8 }
  0x57   :  { %1407 = vmatpush1.bf16.msra.mxu1 %v1406_v2  ;;  %v643_v2 = vld [vmem:[%s2465_s5 + $0x318] sm:$0xff] }
  0x58   :  { %1409 = vmatprep.subr.bf16.mxu1 %v1408_v5  ;;  %v1444_v5 = vpack.c.bf16 %v651_v3, %v643_v2  ;;  %v1494_v2 = vpack.c.bf16 %v590_v60, %v582_v59  ;;  %v596_v3 = vld [vmem:[%s2465_s5 + $0x1a0] sm:$0xff]  ;;  %v674_v60 = vlaneseq }
  0x59   :  { %1381 = vmatpush3.bf16.msra.mxu0 %v1380_v26 }
  0x5a   :  { %1382 = vmatprep.subr.bf16.mxu0 %v1535_v8 }
  0x5d   :  { %1384 = vmatpush3.bf16.msra.mxu0 %v1383_v29 }
  0x5e   :  { %1385 = vmatprep.subr.bf16.mxu0 %v1535_v8  ;;  %v1410_v8 = vpack.c.bf16 %v632_v7, %v624_v6  ;;  %v642_v6 = vld [vmem:[%s2465_s5 + $0x310] sm:$0xff] }
  0x5f   :  { %v650_v7 = vld [vmem:[%s2465_s5 + $0x350] sm:$0xff] }
  0x60   :  { %1411 = vmatpush1.bf16.msra.mxu1 %v1410_v8  ;;  %v1446_v8 = vpack.c.bf16 %v650_v7, %v642_v6  ;;  %v606_v7 = vld [vmem:[%s2465_s5 + $0x1f0] sm:$0xff] }
  0x61   :  { %1387 = vmatpush3.bf16.msra.mxu0 %v1386_v32  ;;  %1413 = vmatprep.subr.bf16.mxu1 %v1412_v11  ;;  %v554_v32 = vld [vmem:[%s2465_s5 + $0x50] sm:$0xff]  ;;  %v659_v11 = vld [vmem:[%s2465_s5 + $0x398] sm:$0xff] }
  0x62   :  { %1421 = vmatprep.subr.bf16.mxu0 %v1420_v41  ;;  %v1422_v37 = vpack.c.bf16 %v554_v32, %v546_v31  ;;  %v570_v41 = vld [vmem:[%s2465_s5 + $0xd0] sm:$0xff]  ;;  %v565_v32 = vld [vmem:[%s2465_s5 + $0xa8] sm:$0xff] }
  0x63   :  { %v1426_v44 = vpack.c.bf16 %v570_v41, %v562_v40  ;;  %v558_v31 = vld [vmem:[%s2465_s5 + $0x70] sm:$0xff] }
  0x64   :  { %1415 = vmatpush1.bf16.msra.mxu1 %v1414_v14  ;;  %v656_v14 = vld [vmem:[%s2465_s5 + $0x380] sm:$0xff] }
  0x65   :  { %1417 = vmatprep.subr.bf16.mxu1 %v1416_v12 }
  0xf7   :  { %v1076_v15 = vpop.f32.mrb[0].mxu0 }
  0xf8   :  { %v1077_v17 = vpop.f32.mrb[1].mxu0 }
  0xf9   :  { %v1111_v18 = vpop.f32.mrb[0].mxu1  ;;  %v1078_v19 = vadd.f32 %v1077_v17, %v1076_v15  ;;  %v664_v15 = vld [vmem:[%s2465_s5 + $0x3c0] sm:$0xff] }
  0xfa   :  { %v1112_v20 = vpop.f32.mrb[1].mxu1  ;;  %v1418_v17 = vpack.c.bf16 %v664_v15, %v656_v14  ;;  %v612_v14 = vld [vmem:[%s2465_s5 + $0x220] sm:$0xff] }
  0xfb   :  { %v1113_v21 = vadd.f32 %v1112_v20, %v1111_v18  ;;  %v236_v22 = vadd.f32 %v1078_v19, %v1042_v16  ;;  %v1448_v16 = vpack.c.bf16 %v667_v13, %v659_v11  ;;  %v658_v18 = vld [vmem:[%s2465_s5 + $0x390] sm:$0xff]  ;;  %v623_v11 = vld [vmem:[%s2465_s5 + $0x278] sm:$0xff]  ;;  %v620_v15 = vld [vmem:[%s2465_s5 + $0x260] sm:$0xff] }
  0xfc   :  { %v666_v19 = vld [vmem:[%s2465_s5 + $0x3d0] sm:$0xff]  ;;  %1419 = vmatpush1.bf16.msra.mxu1 %v1418_v17  ;;  %v1500_v17 = vpack.c.bf16 %v623_v11, %v615_v10 }
  0xfd   :  { %v306_v23 = vadd.f32 %v1113_v21, %v236_v22  ;;  %v1450_v20 = vpack.c.bf16 %v666_v19, %v658_v18  ;;  %v549_v21 = vld [vmem:[%s2465_s5 + $0x28] sm:$0xff]  ;;  %v614_v18 = vld [vmem:[%s2465_s5 + $0x230] sm:$0xff] }
  0xfe   :  { %v557_v22 = vld [vmem:[%s2465_s5 + $0x68] sm:$0xff]  ;;  %v622_v19 = vld [vmem:[%s2465_s5 + $0x270] sm:$0xff] }
 0x117   :  { %v1146_v24 = vpop.f32.mrb[2].mxu0 }
 0x118   :  { %v1147_v25 = vpop.f32.mrb[3].mxu0 }
 0x119   :  { %v1181_v26 = vpop.f32.mrb[2].mxu1  ;;  %v1148_v27 = vadd.f32 %v1147_v25, %v1146_v24  ;;  %v1452_v24 = vpack.c.bf16 %v557_v22, %v549_v21  ;;  %v559_v25 = vld [vmem:[%s2465_s5 + $0x78] sm:$0xff]  ;;  %v637_v21 = vld [vmem:[%s2465_s5 + $0x2e8] sm:$0xff] }
 0x11a   :  { %v1182_v28 = vpop.f32.mrb[3].mxu1  ;;  %v631_v22 = vld [vmem:[%s2465_s5 + $0x2b8] sm:$0xff] }
 0x11b   :  { %v1183_v29 = vadd.f32 %v1182_v28, %v1181_v26  ;;  %v376_v30 = vadd.f32 %v1148_v27, %v306_v23  ;;  %v551_v23 = vld [vmem:[%s2465_s5 + $0x38] sm:$0xff]  ;;  %1453 = vmatprep.subr.bf16.mxu1 %v1452_v24  ;;  %v1043_v27 = vld [vmem:[%s2467_s4] ss:$0 sm:$0xff]  ;;  %v1470_v24 = vpack.c.bf16 %v620_v15, %v612_v14 }
 0x11c   :  { %v1484_v26 = vpack.c.bf16 %v559_v25, %v551_v23  ;;  %v548_v28 = vld [vmem:[%s2465_s5 + $0x20] sm:$0xff]  ;;  %v639_v23 = vld [vmem:[%s2465_s5 + $0x2f8] sm:$0xff]  ;;  %v1502_v25 = vpack.c.bf16 %v622_v19, %v614_v18 }
 0x11d   :  { %v446_v36 = vadd.f32 %v1183_v29, %v376_v30  ;;  %v556_v29 = vld [vmem:[%s2465_s5 + $0x60] sm:$0xff]  ;;  %v550_v30 = vld [vmem:[%s2465_s5 + $0x30] sm:$0xff] }
 0x11e   :  { %v1454_v40 = vpack.c.bf16 %v556_v29, %v548_v28  ;;  %v1486_v41 = vpack.c.bf16 %v558_v31, %v550_v30  ;;  %v1504_v29 = vpack.c.bf16 %v639_v23, %v631_v22  ;;  %v630_v30 = vld [vmem:[%s2465_s5 + $0x2b0] sm:$0xff] }
 0x11f   :  { %v449_v38 = vmax.f32 %v446_v36, 0.0  ;;  %v567_v36 = vld [vmem:[%s2465_s5 + $0xb8] sm:$0xff]  ;;  %v638_v31 = vld [vmem:[%s2465_s5 + $0x2f0] sm:$0xff] }
 0x121   :  { %1234 = vmatmul.mubr.f32.vlgmr.msra.gmra.mrb[4].mxu0 %v449_v38 }
 0x122   :  { %1423 = vmatpush1.bf16.msra.mxu0 %v1422_v37  ;;  %849 = vmatprep.mubr.f32.mxu0 %v1537_v33  ;;  %v575_v37 = vld [vmem:[%s2465_s5 + $0xf8] sm:$0xff] }
 0x123   :  { %1425 = vmatprep.subr.bf16.mxu0 %v1424_v39  ;;  %v1488_v46 = vpack.c.bf16 %v575_v37, %v567_v36  ;;  %v655_v36 = vld [vmem:[%s2465_s5 + $0x378] sm:$0xff] }
 0x126   :  { %1427 = vmatpush1.bf16.msra.mxu0 %v1426_v44 }
 0x127   :  { %1429 = vmatprep.subr.bf16.mxu0 %v1428_v45  ;;  %v1456_v45 = vpack.c.bf16 %v573_v35, %v565_v32  ;;  %v645_v32 = vld [vmem:[%s2465_s5 + $0x328] sm:$0xff]  ;;  %v647_v35 = vld [vmem:[%s2465_s5 + $0x338] sm:$0xff] }
 0x128   :  { %v1508_v42 = vpack.c.bf16 %v655_v36, %v647_v35 }
 0x12a   :  { %1431 = vmatpush1.bf16.msra.mxu0 %v1430_v50  ;;  %v589_v50 = vld [vmem:[%s2465_s5 + $0x168] sm:$0xff] }
 0x12b   :  { %1433 = vmatprep.subr.bf16.mxu0 %v1432_v51  ;;  %v583_v51 = vld [vmem:[%s2465_s5 + $0x138] sm:$0xff] }
 0x12c   :  { %v1492_v58 = vpack.c.bf16 %v591_v52, %v583_v51  ;;  %v660_v52 = vld [vmem:[%s2465_s5 + $0x3a0] sm:$0xff] }
 0x12e   :  { %1435 = vmatpush1.bf16.msra.mxu0 %v1434_v56  ;;  %v588_v56 = vld [vmem:[%s2465_s5 + $0x160] sm:$0xff] }
 0x12f   :  { %1437 = vmatprep.subr.bf16.mxu0 %v1436_v57  ;;  %v1460_v57 = vpack.c.bf16 %v589_v50, %v581_v49  ;;  %v1462_v1 = vpack.c.bf16 %v588_v56, %v580_v55  ;;  %v671_v49 = vld [vmem:[%s2465_s5 + $0x3f8] sm:$0xff]  ;;  %v668_v55 = vld [vmem:[%s2465_s5 + $0x3e0] sm:$0xff]  ;;  %v662_v56 = vld [vmem:[%s2465_s5 + $0x3b0] sm:$0xff] }
 0x132   :  { %1439 = vmatpush1.bf16.msra.mxu0 %v1438_v62  ;;  %v605_v62 = vld [vmem:[%s2465_s5 + $0x1e8] sm:$0xff] }
 0x133   :  { %1441 = vmatprep.subr.bf16.mxu0 %v1440_v63  ;;  %v599_v63 = vld [vmem:[%s2465_s5 + $0x1b8] sm:$0xff] }
 0x134   :  { %v1496_v6 = vpack.c.bf16 %v607_v0, %v599_v63  ;;  %v672_v0 = vld [vmem:[%s2468_s6] sm:$0xff] }
 0x136   :  { %1443 = vmatpush1.bf16.msra.mxu0 %v1442_v4  ;;  %v604_v4 = vld [vmem:[%s2465_s5 + $0x1e0] sm:$0xff] }
 0x137   :  { %1445 = vmatprep.subr.bf16.mxu0 %v1444_v5  ;;  %v1464_v5 = vpack.c.bf16 %v605_v62, %v597_v61  ;;  %v1466_v12 = vpack.c.bf16 %v604_v4, %v596_v3  ;;  %v675_v61 = vshrl.u32 %v674_v60, 7 }
 0x139   :  { %v676_v62 = vsub.s32 0, %v675_v61  ;;  %v684_v63 = vsub.s32 2, %v675_v61 }
 0x13a   :  { %1447 = vmatpush1.bf16.msra.mxu0 %v1446_v8  ;;  %v613_v8 = vld [vmem:[%s2465_s5 + $0x228] sm:$0xff] }
 0x13b   :  { %1449 = vmatprep.subr.bf16.mxu0 %v1448_v16  ;;  %v1468_v16 = vpack.c.bf16 %v621_v9, %v613_v8  ;;  %v677_v3 = vrot.slane %v672_v0, %v676_v62  ;;  %v685_v4 = vrot.slane %v672_v0, %v684_v63 }
 0x13e   :  { %1451 = vmatpush1.bf16.msra.mxu0 %v1450_v20  ;;  %v629_v20 = vld [vmem:[%s2465_s5 + $0x2a8] sm:$0xff] }
 0x13f   :  { %1485 = vmatprep.subr.bf16.mxu0 %v1484_v26  ;;  %v628_v26 = vld [vmem:[%s2465_s5 + $0x2a0] sm:$0xff]  ;;  %v1472_v28 = vpack.c.bf16 %v637_v21, %v629_v20 }
 0x1f4   :  { %v539_v34 = vpop.f32.mrb[4].mxu0 }
 0x1f5   :  { %v540_v38 = vadd.f32 %v1043_v27, %v539_v34  ;;  %v1235_v39 = vpop.f32.mrb[5].mxu0  ;;  %v636_v27 = vld [vmem:[%s2465_s5 + $0x2e0] sm:$0xff]  ;;  %v653_v34 = vld [vmem:[%s2465_s5 + $0x368] sm:$0xff] }
 0x1f6   :  { %v1474_v37 = vpack.c.bf16 %v636_v27, %v628_v26  ;;  %v644_v39 = vld [vmem:[%s2465_s5 + $0x320] sm:$0xff] }
 0x1f7   :  { %v2277_v44 = vmax.f32 %v540_v38, 0.0  ;;  %v1506_v38 = vpack.c.bf16 %v638_v31, %v630_v30  ;;  %v700_v30 = vsub.s32 6, %v675_v61  ;;  %v696_v31 = vsub.s32 5, %v675_v61 }
 0x1f9   :  { %779 = vmatmul.mubr.f32.vlgmr.msra.gmra.mrb[4].mxu1 %v2277_v44  ;;  %850 = vmatmul.mubr.f32.vlgmr.msra.gmra.mrb[6].mxu0 %v2277_v44  ;;  %v701_v35 = vrot.slane %v672_v0, %v700_v30  ;;  %v697_v36 = vrot.slane %v672_v0, %v696_v31 }
 0x1fa   :  { %1455 = vmatpush1.bf16.msra.mxu1 %v1454_v40  ;;  %1487 = vmatpush1.bf16.msra.mxu0 %v1486_v41  ;;  %v652_v40 = vld [vmem:[%s2465_s5 + $0x360] sm:$0xff]  ;;  %v1476_v41 = vpack.c.bf16 %v653_v34, %v645_v32  ;;  %v704_v32 = vsub.s32 7, %v675_v61 }
 0x1fb   :  { %1457 = vmatprep.subr.bf16.mxu1 %v1456_v45  ;;  %1489 = vmatprep.subr.bf16.mxu0 %v1488_v46  ;;  %v654_v45 = vld [vmem:[%s2465_s5 + $0x370] sm:$0xff]  ;;  %v661_v46 = vld [vmem:[%s2465_s5 + $0x3a8] sm:$0xff]  ;;  %v1478_v50 = vpack.c.bf16 %v652_v40, %v644_v39 }
 0x1fc   :  { %920 = vmatprep.mubr.f32.mxu1 %v1537_v33  ;;  %991 = vmatprep.mubr.f32.mxu0 %v1537_v33  ;;  %v598_v33 = vld [vmem:[%s2465_s5 + $0x1b0] sm:$0xff]  ;;  %v1510_v51 = vpack.c.bf16 %v654_v45, %v646_v43 }
 0x1fd   :  { %v1498_v13 = vpack.c.bf16 %v606_v7, %v598_v33 }
 0x1fe   :  { %1459 = vmatpush1.bf16.msra.mxu1 %v1458_v53  ;;  %1491 = vmatpush1.bf16.msra.mxu0 %v1490_v54  ;;  %v1480_v53 = vpack.c.bf16 %v669_v47, %v661_v46  ;;  %v1512_v54 = vpack.c.bf16 %v671_v49, %v663_v48 }
 0x1ff   :  { %1461 = vmatprep.subr.bf16.mxu1 %v1460_v57  ;;  %1493 = vmatprep.subr.bf16.mxu0 %v1492_v58  ;;  %v670_v57 = vld [vmem:[%s2465_s5 + $0x3f0] sm:$0xff]  ;;  %v1482_v58 = vpack.c.bf16 %v668_v55, %v660_v52 }
 0x200   :  { %v1514_v59 = vpack.c.bf16 %v670_v57, %v662_v56 }
 0x202   :  { %1463 = vmatpush1.bf16.msra.mxu1 %v1462_v1  ;;  %1495 = vmatpush1.bf16.msra.mxu0 %v1494_v2  ;;  %v680_v1 = vsub.s32 1, %v675_v61  ;;  %v688_v2 = vsub.s32 3, %v675_v61 }
 0x203   :  { %1465 = vmatprep.subr.bf16.mxu1 %v1464_v5  ;;  %1497 = vmatprep.subr.bf16.mxu0 %v1496_v6 }
 0x204   :  { %v681_v5 = vrot.slane %v672_v0, %v680_v1  ;;  %v689_v6 = vrot.slane %v672_v0, %v688_v2 }
 0x206   :  { %1467 = vmatpush1.bf16.msra.mxu1 %v1466_v12  ;;  %1499 = vmatpush1.bf16.msra.mxu0 %v1498_v13 }
 0x207   :  { %1469 = vmatprep.subr.bf16.mxu1 %v1468_v16  ;;  %1501 = vmatprep.subr.bf16.mxu0 %v1500_v17 }
 0x20a   :  { %1471 = vmatpush1.bf16.msra.mxu1 %v1470_v24  ;;  %1503 = vmatpush1.bf16.msra.mxu0 %v1502_v25 }
 0x20b   :  { %1473 = vmatprep.subr.bf16.mxu1 %v1472_v28  ;;  %1505 = vmatprep.subr.bf16.mxu0 %v1504_v29  ;;  %v692_v29 = vsub.s32 4, %v675_v61 }
 0x20d   :  { %v693_v34 = vrot.slane %v672_v0, %v692_v29 }
 0x20e   :  { %1475 = vmatpush1.bf16.msra.mxu1 %v1474_v37  ;;  %1507 = vmatpush1.bf16.msra.mxu0 %v1506_v38  ;;  %v705_v37 = vrot.slane %v672_v0, %v704_v32 }
 0x20f   :  { %1477 = vmatprep.subr.bf16.mxu1 %v1476_v41  ;;  %1509 = vmatprep.subr.bf16.mxu0 %v1508_v42 }
 0x212   :  { %1479 = vmatpush1.bf16.msra.mxu1 %v1478_v50  ;;  %1511 = vmatpush1.bf16.msra.mxu0 %v1510_v51 }
 0x213   :  { %1481 = vmatprep.subr.bf16.mxu1 %v1480_v53  ;;  %1513 = vmatprep.subr.bf16.mxu0 %v1512_v54 }
 0x216   :  { %1483 = vmatpush1.bf16.msra.mxu1 %v1482_v58  ;;  %1515 = vmatpush1.bf16.msra.mxu0 %v1514_v59 }
 0x219   :  { %921 = vmatmul.mubr.f32.vlgmr.msra.gmra.mrb[6].mxu1 %v2277_v44  ;;  %992 = vmatmul.mubr.f32.vlgmr.msra.gmra.mrb[8].mxu0 %v2277_v44 }
 0x2cc   :  { %v780_v33 = vpop.f32.mrb[4].mxu1  ;;  %v851_v7 = vpop.f32.mrb[6].mxu0 }
 0x2cd   :  { %v781_v8 = vadd.f32 %v780_v33, %v677_v3  ;;  %v852_v9 = vadd.f32 %v851_v7, %v685_v4  ;;  %v782_v10 = vpop.f32.mrb[5].mxu1  ;;  %v853_v44 = vpop.f32.mrb[7].mxu0 }
 0x2ce   :  { %v783_v11 = vadd.f32 %v782_v10, %v681_v5  ;;  %v854_v12 = vadd.f32 %v853_v44, %v689_v6 }
 0x2cf   :  { %v998_v13 = vmul.f32 0.5, %v781_v8  ;;  %v1000_v14 = vmul.f32 0.5, %v852_v9 }
 0x2d0   :  { %v999_v15 = vmul.f32 0.5, %v783_v11  ;;  %v1001_v16 = vmul.f32 0.5, %v854_v12 }
 0x2d1   :  { %1519 = vtanh.f32 %v998_v13 }
 0x2d2   :  { %1521 = vtanh.f32 %v1000_v14 }
 0x2d3   :  { %1523 = vtanh.f32 %v999_v15 }
 0x2d4   :  { %1525 = vtanh.f32 %v1001_v16 }
 0x2db   :  { %v1520_v17 = vpop.eup %1519 }
 0x2dc   :  { %v1522_v18 = vpop.eup %1521  ;;  %v1014_v19 = vmul.f32 0.5, %v1520_v17 }
 0x2dd   :  { %v1524_v20 = vpop.eup %1523  ;;  %v1016_v21 = vmul.f32 0.5, %v1522_v18 }
 0x2de   :  { %v1526_v22 = vpop.eup %1525  ;;  %v1022_v23 = vadd.f32 0.5, %v1014_v19  ;;  %v1015_v24 = vmul.f32 0.5, %v1524_v20 }
 0x2df   :  { %v1024_v25 = vadd.f32 0.5, %v1016_v21  ;;  %v1017_v26 = vmul.f32 0.5, %v1526_v22 }
 0x2e0   :  { %1030 = vst [vmem:[%s2469_s7] sm:$0xff] %v1022_v23  ;;  %v1023_v27 = vadd.f32 0.5, %v1015_v24 }
 0x2e1   :  { %1032 = vst [vmem:[%s2469_s7 + $0x10] sm:$0xff] %v1024_v25  ;;  %v1025_v28 = vadd.f32 0.5, %v1017_v26 }
 0x2e2   :  { %1031 = vst [vmem:[%s2469_s7 + $0x8] sm:$0xff] %v1023_v27 }
 0x2e3   :  { %1033 = vst [vmem:[%s2469_s7 + $0x18] sm:$0xff] %v1025_v28 }
 0x2ec   :  { %v922_v38 = vpop.f32.mrb[6].mxu1  ;;  %v993_v39 = vpop.f32.mrb[8].mxu0 }
 0x2ed   :  { %v923_v40 = vadd.f32 %v922_v38, %v693_v34  ;;  %v994_v41 = vadd.f32 %v993_v39, %v701_v35  ;;  %v924_v42 = vpop.f32.mrb[7].mxu1  ;;  %v995_v43 = vpop.f32.mrb[9].mxu0 }
 0x2ee   :  { %v925_v45 = vadd.f32 %v924_v42, %v697_v36  ;;  %v996_v46 = vadd.f32 %v995_v43, %v705_v37 }
 0x2ef   :  { %v1002_v47 = vmul.f32 0.5, %v923_v40  ;;  %v1004_v48 = vmul.f32 0.5, %v994_v41 }
 0x2f0   :  { %v1003_v49 = vmul.f32 0.5, %v925_v45  ;;  %v1005_v50 = vmul.f32 0.5, %v996_v46 }
 0x2f1   :  { %1527 = vtanh.f32 %v1002_v47 }
 0x2f2   :  { %1529 = vtanh.f32 %v1004_v48 }
 0x2f3   :  { %1531 = vtanh.f32 %v1003_v49 }
 0x2f4   :  { %1533 = vtanh.f32 %v1005_v50 }
 0x2fb   :  { %v1528_v51 = vpop.eup %1527 }
 0x2fc   :  { %v1530_v52 = vpop.eup %1529  ;;  %v1018_v53 = vmul.f32 0.5, %v1528_v51 }
 0x2fd   :  { %v1532_v54 = vpop.eup %1531  ;;  %v1020_v55 = vmul.f32 0.5, %v1530_v52 }
 0x2fe   :  { %v1534_v56 = vpop.eup %1533  ;;  %v1026_v57 = vadd.f32 0.5, %v1018_v53  ;;  %v1019_v58 = vmul.f32 0.5, %v1532_v54 }
 0x2ff   :  { %v1028_v59 = vadd.f32 0.5, %v1020_v55  ;;  %v1021_v60 = vmul.f32 0.5, %v1534_v56 }
 0x300   :  { %1034 = vst [vmem:[%s2469_s7 + $0x20] sm:$0xff] %v1026_v57  ;;  %v1027_v61 = vadd.f32 0.5, %v1019_v58 }
 0x301   :  { %1036 = vst [vmem:[%s2469_s7 + $0x30] sm:$0xff] %v1028_v59  ;;  %v1029_v62 = vadd.f32 0.5, %v1021_v60 }
 0x302   :  { %1035 = vst [vmem:[%s2469_s7 + $0x28] sm:$0xff] %v1027_v61 }
 0x303   :  { %1037 = vst [vmem:[%s2469_s7 + $0x38] sm:$0xff] %v1029_v62 }

</bundles_post_ra>
